<compile_context>
chip_gen: v7x
topology: tpu7x:2x2x1
jax: 0.10.0
libtpu: 0.0.40
codegen_flags: <defaults>
</compile_context>

<pallas_src>
import functools

import jax
import jax.numpy as jnp
from jax.experimental import pallas as pl
from jax.experimental.pallas import tpu as pltpu


def _round_up(x, m):
    return (x + m - 1) // m * m


# ------------------------------ Pallas kernels ------------------------------ #
def conv_relu_single_k_kernel(p_ref, w_ref, b_ref, o_ref):
    # p_ref: (TM, Kp) bf16 patches   w_ref: (Kp, Np) bf16 weights (resident)
    # b_ref: (1, Np)  f32 bias       o_ref: (TM, Np) f32 output (lane-dense)
    y = jnp.dot(p_ref[...], w_ref[...], preferred_element_type=jnp.float32)
    o_ref[...] = jnp.maximum(y + b_ref[...], 0.0).astype(o_ref.dtype)


def conv_relu_multi_k_kernel(p_ref, w_ref, b_ref, o_ref):
    # Output block is VMEM-resident across the kk axis (index_map ignores kk),
    # so accumulate directly into it -- no separate accumulator scratch.
    kk = pl.program_id(1)

    @pl.when(kk == 0)
    def _():
        o_ref[...] = jnp.zeros_like(o_ref)

    o_ref[...] += jnp.dot(p_ref[...], w_ref[...],
                          preferred_element_type=jnp.float32)

    @pl.when(kk == pl.num_programs(1) - 1)
    def _():
        o_ref[...] = jnp.maximum(o_ref[...] + b_ref[...], 0.0)


# --------------------------------- glue (JAX) -------------------------------- #
def extract_patches_nchw(x, k, stride):
    """x: (B, Cin, H, W) -> patches (B*Ho*Wo, Cin*k*k), cols ordered (cin, ki, kj).

    Uses the fused conv_general_dilated_patches op (no k*k python-slice stack);
    call with x already in bf16 so the intermediate stays bf16.
    """
    B, Cin, H, W = x.shape
    Ho = (H - k) // stride + 1
    Wo = (W - k) // stride + 1
    p = jax.lax.conv_general_dilated_patches(
        x, filter_shape=(k, k), window_strides=(stride, stride),
        padding="VALID")                              # (B, Cin*k*k, Ho, Wo)
    p = jnp.transpose(p, (0, 2, 3, 1))                # (B, Ho, Wo, Cin*k*k)
    return p.reshape(B * Ho * Wo, Cin * k * k), Ho, Wo


def _vmem_limit_bytes(need_bytes):
    """Generation-aware VMEM limit: leave headroom below physical capacity."""
    try:
        cap = int(pltpu.get_tpu_info().vmem_capacity_bytes)
    except Exception:
        cap = 64 << 20  # conservative fallback (v7x-sized per-core VMEM)
    ceiling = cap * 4 // 5
    return int(max(min(need_bytes + (4 << 20), ceiling), min(32 << 20, ceiling)))


@functools.partial(jax.jit,
                   static_argnames=("kernel_size", "stride", "padding",
                                    "tm", "tk", "single_k_max"))
def conv_layer_forward(x, weight, bias, *, kernel_size, stride=1, padding=0,
                       tm=512, tk=512, single_k_max=4096):
    """
    x:      (B, Cin, H, W)        float32, NCHW
    weight: (out_ch, Cin, k, k)   float32 (torch Conv2d OIHW)
    bias:   (out_ch,)             float32
    returns (B, out_ch, Ho, Wo)   float32  == relu(conv2d(x)) (torch semantics)
    """
    if padding > 0:
        x = jnp.pad(x, ((0, 0), (0, 0), (padding, padding), (padding, padding)))
    B, Cin, H, W = x.shape
    out_ch = weight.shape[0]
    k = kernel_size

    # bf16-first patch extraction (halves intermediate HBM traffic; f32 accumulate
    # happens inside the kernel on the MXU).
    patches, Ho, Wo = extract_patches_nchw(x.astype(jnp.bfloat16), k, stride)
    M = B * Ho * Wo
    K = Cin * k * k
    N = out_ch

    # ---- tile / pad sizes -------------------------------------------------- #
    Np = _round_up(N, 128)                 # lane-dense output
    K128 = _round_up(K, 128)
    single_k = K128 <= single_k_max
    if single_k:
        tk_eff = Kp = K128                 # one K step, weights grid-resident
    else:
        tk_eff = min(_round_up(tk, 256), K128)   # 256-multiple K passes (v6e/v7x MXU)
        Kp = _round_up(K, tk_eff)
        single_k = (Kp == tk_eff)

    tm_eff = min(_round_up(tm, 128), _round_up(M, 128))
    # v7x has 2 TensorCores sharding the "parallel" M axis: prefer >= 2 M tiles.
    if M > 128 and _round_up(M, tm_eff) == tm_eff:
        tm_eff = _round_up((M + 1) // 2, 128)
    Mp = _round_up(M, tm_eff)

    # ---- operands ---------------------------------------------------------- #
    p_pad = jnp.pad(patches, ((0, Mp - M), (0, Kp - K)))            # bf16
    w_mat = weight.reshape(out_ch, K).T                              # (K, N)
    w_pad = jnp.pad(w_mat.astype(jnp.bfloat16), ((0, Kp - K), (0, Np - N)))
    b_pad = jnp.pad(bias.astype(jnp.float32), (0, Np - N)).reshape(1, Np)

    # ---- pallas_call ------------------------------------------------------- #
    if single_k:
        need = (2 * tm_eff * Kp * 2 + 2 * Kp * Np * 2 + 2 * Np * 4
                + 2 * tm_eff * Np * 4)
        out = pl.pallas_call(
            conv_relu_single_k_kernel,
            out_shape=jax.ShapeDtypeStruct((Mp, Np), jnp.float32),
            grid_spec=pltpu.PrefetchScalarGridSpec(
                num_scalar_prefetch=0,
                grid=(Mp // tm_eff,),
                in_specs=[
                    pl.BlockSpec((tm_eff, Kp), lambda i: (i, 0)),
                    pl.BlockSpec((Kp, Np), lambda i: (0, 0)),   # fetched once
                    pl.BlockSpec((1, Np), lambda i: (0, 0)),
                ],
                out_specs=pl.BlockSpec((tm_eff, Np), lambda i: (i, 0)),
            ),
            compiler_params=pltpu.CompilerParams(
                dimension_semantics=("parallel",),
                vmem_limit_bytes=_vmem_limit_bytes(need)),
        )(p_pad, w_pad, b_pad)
    else:
        need = (2 * tm_eff * tk_eff * 2 + 2 * tk_eff * Np * 2 + 2 * Np * 4
                + 2 * tm_eff * Np * 4)
        out = pl.pallas_call(
            conv_relu_multi_k_kernel,
            out_shape=jax.ShapeDtypeStruct((Mp, Np), jnp.float32),
            grid_spec=pltpu.PrefetchScalarGridSpec(
                num_scalar_prefetch=0,
                grid=(Mp // tm_eff, Kp // tk_eff),
                in_specs=[
                    pl.BlockSpec((tm_eff, tk_eff), lambda i, kk: (i, kk)),
                    pl.BlockSpec((tk_eff, Np), lambda i, kk: (kk, 0)),
                    pl.BlockSpec((1, Np), lambda i, kk: (0, 0)),
                ],
                out_specs=pl.BlockSpec((tm_eff, Np), lambda i, kk: (i, 0)),
            ),
            compiler_params=pltpu.CompilerParams(
                dimension_semantics=("parallel", "arbitrary"),
                vmem_limit_bytes=_vmem_limit_bytes(need)),
        )(p_pad, w_pad, b_pad)

    # Strip padding, restore NCHW: rows (b, ho, wo), cols oc.
    out = out[:M, :N].reshape(B, Ho, Wo, out_ch)
    return jnp.transpose(out, (0, 3, 1, 2))


# ----------------------------- pure-JAX reference ---------------------------- #
def conv_layer_reference(x, weight, bias, *, stride=1, padding=0):
    y = jax.lax.conv_general_dilated(
        x, weight, window_strides=(stride, stride),
        padding=((padding, padding), (padding, padding)),
        dimension_numbers=("NCHW", "OIHW", "NCHW"))
    y = y + bias[None, :, None, None]
    return jnp.maximum(y, 0.0)


# ------------------------------------ main ----------------------------------- #
if __name__ == "__main__":
    # Small shapes consistent with the module (padding=0, k=9, stride=1).
    B, Cin, H, W = 2, 4, 16, 16
    out_ch, kernel_size, stride, padding = 32, 9, 1, 0   # -> Ho = Wo = 8

    key = jax.random.PRNGKey(0)
    kx, kw, kb = jax.random.split(key, 3)

    x = jax.random.normal(kx, (B, Cin, H, W), dtype=jnp.float32)

    # torch Conv2d default init: uniform +/- 1/sqrt(fan_in).
    fan_in = Cin * kernel_size * kernel_size
    bound = 1.0 / float(jnp.sqrt(jnp.float32(fan_in)))
    weight = jax.random.uniform(kw, (out_ch, Cin, kernel_size, kernel_size),
                                dtype=jnp.float32, minval=-bound, maxval=bound)
    bias = jax.random.uniform(kb, (out_ch,),
                              dtype=jnp.float32, minval=-bound, maxval=bound)

    ref = conv_layer_reference(x, weight, bias, stride=stride, padding=padding)
    ref = jax.block_until_ready(ref)

    # Path 1 (default): single K step, weights grid-resident (K=324 -> Kp=384).
    out = conv_layer_forward(x, weight, bias,
                             kernel_size=kernel_size, stride=stride,
                             padding=padding)
    out = jax.block_until_ready(out)
    assert out.shape == (B, out_ch, 8, 8), out.shape
    # Loose tolerance accounts for bf16 operands (f32 accumulation in-kernel).
    assert jnp.allclose(out, ref, atol=2e-2, rtol=2e-2), (
        "single-K mismatch vs reference: max abs diff = "
        f"{float(jnp.max(jnp.abs(out - ref)))}")

    # Path 2: force the multi-K reduction path (K=324 -> Kp=512, 2 K steps).
    out2 = conv_layer_forward(x, weight, bias,
                              kernel_size=kernel_size, stride=stride,
                              padding=padding, tk=256, single_k_max=0)
    out2 = jax.block_until_ready(out2)
    assert out2.shape == (B, out_ch, 8, 8), out2.shape
    assert jnp.allclose(out2, ref, atol=2e-2, rtol=2e-2), (
        "multi-K mismatch vs reference: max abs diff = "
        f"{float(jnp.max(jnp.abs(out2 - ref)))}")

    print("KERNEL_OK")
</pallas_src>

<mosaic_0001>
module attributes {stable_mosaic.version = 11 : i64} {
  func.func @conv_relu_single_k_kernel(%arg0: i32, %arg1: memref<128x384xbf16, #tpu.memory_space<vmem>>, %arg2: memref<384x128xbf16, #tpu.memory_space<vmem>>, %arg3: memref<1x128xf32, #tpu.memory_space<vmem>>, %arg4: memref<128x128xf32, #tpu.memory_space<vmem>>) attributes {dimension_semantics = [#tpu.dimension_semantics<parallel>], iteration_bounds = array<i64: 1>, scalar_prefetch = 0 : i64, scratch_operands = 0 : i64, tpu.core_type = #tpu.core_type<tc>, window_params = [{transform_indices = @transform_0, window_bounds = array<i64: 128, 384>}, {pipeline_mode = #tpu.pipeline_mode<synchronous>, transform_indices = @transform_1, window_bounds = array<i64: 384, 128>}, {pipeline_mode = #tpu.pipeline_mode<synchronous>, transform_indices = @transform_2, window_bounds = array<i64: 1, 128>}, {transform_indices = @transform_3, window_bounds = array<i64: 128, 128>}]} {
    %c0 = arith.constant 0 : index
    %c0_0 = arith.constant 0 : index
    %0 = vector.load %arg1[%c0, %c0_0] : memref<128x384xbf16, #tpu.memory_space<vmem>>, vector<128x384xbf16>
    %c0_1 = arith.constant 0 : index
    %c0_2 = arith.constant 0 : index
    %1 = vector.load %arg2[%c0_1, %c0_2] : memref<384x128xbf16, #tpu.memory_space<vmem>>, vector<384x128xbf16>
    %cst = arith.constant dense<0.000000e+00> : vector<128x128xf32>
    %2 = tpu.matmul %0, %1, %cst {dimension_numbers = #tpu.dot_dimension_numbers<[1], [0], [0], [1], [0, 0, 1, 1], [], []>} : vector<128x384xbf16>, vector<384x128xbf16>, vector<128x128xf32> -> vector<128x128xf32>
    %c0_3 = arith.constant 0 : index
    %c0_4 = arith.constant 0 : index
    %3 = vector.load %arg3[%c0_3, %c0_4] : memref<1x128xf32, #tpu.memory_space<vmem>>, vector<1x128xf32>
    %4 = vector.broadcast %3 : vector<1x128xf32> to vector<128x128xf32>
    %5 = arith.addf %2, %4 : vector<128x128xf32>
    %cst_5 = arith.constant 0.000000e+00 : f32
    %6 = vector.broadcast %cst_5 : f32 to vector<128x128xf32>
    %7 = arith.maximumf %5, %6 : vector<128x128xf32>
    %c0_6 = arith.constant 0 : index
    %c0_7 = arith.constant 0 : index
    %8 = vector.load %arg4[%c0_6, %c0_7] : memref<128x128xf32, #tpu.memory_space<vmem>>, vector<128x128xf32>
    tpu.vector_store %arg4[%c0_6, %c0_7], %7 {strides = array<i32>} : memref<128x128xf32, #tpu.memory_space<vmem>>, vector<128x128xf32>,
    return
  }
  func.func @transform_0(%arg0: i32) -> (i32, i32) {
    %c0_i32 = arith.constant 0 : i32
    %c0_i32_0 = arith.constant 0 : i32
    return %arg0, %c0_i32 : i32, i32
  }
  func.func @transform_1(%arg0: i32) -> (i32, i32) {
    %c0_i32 = arith.constant 0 : i32
    %c0_i32_0 = arith.constant 0 : i32
    %c0_i32_1 = arith.constant 0 : i32
    return %c0_i32, %c0_i32_0 : i32, i32
  }
  func.func @transform_2(%arg0: i32) -> (i32, i32) {
    %c0_i32 = arith.constant 0 : i32
    %c0_i32_0 = arith.constant 0 : i32
    %c0_i32_1 = arith.constant 0 : i32
    return %c0_i32, %c0_i32_0 : i32, i32
  }
  func.func @transform_3(%arg0: i32) -> (i32, i32) {
    %c0_i32 = arith.constant 0 : i32
    %c0_i32_0 = arith.constant 0 : i32
    return %arg0, %c0_i32 : i32, i32
  }
}

</mosaic_0001>

<bundles_post_ra>
// kernel: conv_layer_forward.1
= control target key start
LH: loop header
LB: loop body
LE: loop exit
PB: predicated region body
PF: predicated region fallthrough
CT: control target
= control target key end

     0   :  { %s1067_s0 = inlined_call_operand.vmem [shape: bf16[128,384], index: 0, kind: input, shape index: {}]   ;;  %s1068_s1 = inlined_call_operand.vmem [shape: bf16[384,128], index: 1, kind: input, shape index: {}]   ;;  %s1069_s2 = inlined_call_operand.vmem [shape: f32[1,128], index: 2, kind: input, shape index: {}]   ;;  %s1070_s3 = inlined_call_operand.hbm [shape: f32[128,128], index: 3, kind: output, shape index: {}]  }
   0x1   :  { %v781_v0 = vld [vmem:[%s1068_s1 + $0x40] sm:$0xff]   ;;  %v783_v2 = vld [vmem:[%s1068_s1 + $0x48] sm:$0xff]   ;;  %v786_v5 = vld [vmem:[%s1068_s1 + $0x50] sm:$0xff]  }
   0x2   :  { %v782_v1 = vld [vmem:[%s1068_s1] sm:$0xff]   ;;  %666 = vmatprep.subr.bf16.mxu0 %v781_v0  ;;  %v785_v4 = vld [vmem:[%s1068_s1 + $0x8] sm:$0xff]   ;;  %v788_v7 = vld [vmem:[%s1068_s1 + $0x10] sm:$0xff]  }
   0x3   :  { %667 = vmatpush3.bf16.msra.mxu0 %v782_v1  ;;  %v784_v3 = vld [vmem:[%s1068_s1 + $0x80] sm:$0xff]   ;;  %v787_v6 = vld [vmem:[%s1068_s1 + $0x88] sm:$0xff]   ;;  %v789_v8 = vld [vmem:[%s1068_s1 + $0x58] sm:$0xff]  }
   0x4   :  { %668 = vmatprep.subr.bf16.mxu0 %v783_v2  ;;  %746 = vmatprep.subr.bf16.mxu1 %v784_v3  ;;  %v790_v9 = vld [vmem:[%s1068_s1 + $0x90] sm:$0xff]   ;;  %v791_v10 = vld [vmem:[%s1068_s1 + $0x18] sm:$0xff]   ;;  %v792_v11 = vld [vmem:[%s1068_s1 + $0x60] sm:$0xff]  }
   0x5   :  { %747 = vmatpush3.bf16.msra.mxu1 %v784_v3  ;;  %v793_v12 = vld [vmem:[%s1068_s1 + $0x98] sm:$0xff]   ;;  %v794_v13 = vld [vmem:[%s1068_s1 + $0x20] sm:$0xff]   ;;  %v795_v15 = vld [vmem:[%s1068_s1 + $0x68] sm:$0xff]  }
   0x6   :  { %748 = vmatprep.subr.bf16.mxu1 %v787_v6  ;;  %v796_v14 = vld [vmem:[%s1068_s1 + $0xa0] sm:$0xff]   ;;  %v797_v16 = vld [vmem:[%s1068_s1 + $0x28] sm:$0xff]   ;;  %v798_v18 = vld [vmem:[%s1068_s1 + $0x70] sm:$0xff]  }
   0x7   :  { %669 = vmatpush3.bf16.msra.mxu0 %v785_v4  ;;  %v799_v17 = vld [vmem:[%s1068_s1 + $0xa8] sm:$0xff]   ;;  %v800_v19 = vld [vmem:[%s1068_s1 + $0x30] sm:$0xff]   ;;  %v801_v20 = vld [vmem:[%s1068_s1 + $0x78] sm:$0xff]  }
   0x8   :  { %670 = vmatprep.subr.bf16.mxu0 %v786_v5  ;;  %v802_v21 = vld [vmem:[%s1068_s1 + $0xb0] sm:$0xff]   ;;  %v803_v23 = vld [vmem:[%s1068_s1 + $0x38] sm:$0xff]   ;;  %v804_v26 = vld [vmem:[%s1067_s0] ss:$12 sps:$4 sm:$0xff]  }
   0x9   :  { %749 = vmatpush3.bf16.msra.mxu1 %v787_v6  ;;  %v806_v22 = vld [vmem:[%s1067_s0 + $0x4] ss:$12 sps:$4 sm:$0xff]   ;;  %v808_v24 = vld [vmem:[%s1067_s0 + $0x8] ss:$12 sps:$4 sm:$0xff]   ;;  %v807_v25 = vld [vmem:[%s1068_s1 + $0xb8] sm:$0xff]  }
   0xa   :  { %750 = vmatprep.subr.bf16.mxu1 %v790_v9  ;;  %407 = vmatprep.mubr.bf16.mxu0 %v806_v22  ;;  %v810_v27 = vld [vmem:[%s1067_s0 + $0x1c] ss:$12 sps:$4 sm:$0xff]   ;;  %v809_v28 = vld [vmem:[%s1067_s0 + $0x20] ss:$12 sps:$4 sm:$0xff]   ;;  %v816_v29 = vld [vmem:[%s1067_s0 + $0x38] ss:$12 sps:$4 sm:$0xff]  }
   0xb   :  { %671 = vmatpush3.bf16.msra.mxu0 %v788_v7  ;;  %762 = vmatprep.mubr.bf16.mxu1 %v808_v24  ;;  %v812_v30 = vld [vmem:[%s1067_s0 + $0x18] ss:$12 sps:$4 sm:$0xff]   ;;  %v813_v31 = vld [vmem:[%s1067_s0 + $0x34] ss:$12 sps:$4 sm:$0xff]   ;;  %v817_v32 = vld [vmem:[%s1067_s0 + $0x50] ss:$12 sps:$4 sm:$0xff]  }
   0xc   :  { %672 = vmatprep.subr.bf16.mxu0 %v789_v8  ;;  %v824_v33 = vld [vmem:[%s1067_s0 + $0x68] ss:$12 sps:$4 sm:$0xff]  }
   0xd   :  { %751 = vmatpush3.bf16.msra.mxu1 %v790_v9 }
   0xe   :  { %752 = vmatprep.subr.bf16.mxu1 %v793_v12 }
   0xf   :  { %673 = vmatpush3.bf16.msra.mxu0 %v791_v10 }
  0x10   :  { %674 = vmatprep.subr.bf16.mxu0 %v792_v11 }
  0x11   :  { %753 = vmatpush3.bf16.msra.mxu1 %v793_v12 }
  0x12   :  { %754 = vmatprep.subr.bf16.mxu1 %v796_v14 }
  0x13   :  { %675 = vmatpush3.bf16.msra.mxu0 %v794_v13 }
  0x14   :  { %676 = vmatprep.subr.bf16.mxu0 %v795_v15 }
  0x15   :  { %755 = vmatpush3.bf16.msra.mxu1 %v796_v14 }
  0x16   :  { %756 = vmatprep.subr.bf16.mxu1 %v799_v17 }
  0x17   :  { %677 = vmatpush3.bf16.msra.mxu0 %v797_v16 }
  0x18   :  { %678 = vmatprep.subr.bf16.mxu0 %v798_v18 }
  0x19   :  { %757 = vmatpush3.bf16.msra.mxu1 %v799_v17 }
  0x1a   :  { %758 = vmatprep.subr.bf16.mxu1 %v802_v21 }
  0x1b   :  { %679 = vmatpush3.bf16.msra.mxu0 %v800_v19 }
  0x1c   :  { %680 = vmatprep.subr.bf16.mxu0 %v801_v20 }
  0x1d   :  { %759 = vmatpush3.bf16.msra.mxu1 %v802_v21 }
  0x1e   :  { %760 = vmatprep.subr.bf16.mxu1 %v807_v25 }
  0x1f   :  { %681 = vmatpush3.bf16.msra.mxu0 %v803_v23 }
  0x21   :  { %761 = vmatpush3.bf16.msra.mxu1 %v807_v25 }
  0x22   :  { %408 = vmatmul.mubr.bf16.vlgmr.msra.gmra.mrb[0].mxu0 %v804_v26 }
  0x23   :  { %415 = vmatprep.mubr.bf16.mxu0 %v810_v27 }
  0x24   :  { %763 = vmatmul.mubr.bf16.vlgmr.msra.gmra.mrb[0].mxu1 %v809_v28 }
  0x25   :  { %766 = vmatprep.mubr.bf16.mxu1 %v816_v29 }
  0x2a   :  { %416 = vmatmul.mubr.bf16.gmra.mrb[4].mxu0 %v812_v30 }
  0x2b   :  { %8 = vsyncpa [#allocation3], 0  ;;  %423 = vmatprep.mubr.bf16.mxu0 %v813_v31  ;;  %v815_v34 = vld [vmem:[%s1067_s0 + $0x30] ss:$12 sps:$4 sm:$0xff]   ;;  %v818_v35 = vld [vmem:[%s1067_s0 + $0x4c] ss:$12 sps:$4 sm:$0xff]  }
  0x2c   :  { %767 = vmatmul.mubr.bf16.gmra.mrb[4].mxu1 %v817_v32  ;;  %v825_v36 = vld [vmem:[%s1067_s0 + $0x80] ss:$12 sps:$4 sm:$0xff]   ;;  %v832_v37 = vld [vmem:[%s1067_s0 + $0x98] ss:$12 sps:$4 sm:$0xff]   ;;  %v820_v38 = vld [vmem:[%s1067_s0 + $0x48] ss:$12 sps:$4 sm:$0xff]  }
  0x2d   :  { %770 = vmatprep.mubr.bf16.mxu1 %v824_v33  ;;  %v821_v39 = vld [vmem:[%s1067_s0 + $0x64] ss:$12 sps:$4 sm:$0xff]   ;;  %v823_v41 = vld [vmem:[%s1067_s0 + $0x60] ss:$12 sps:$4 sm:$0xff]   ;;  %v826_v42 = vld [vmem:[%s1067_s0 + $0x7c] ss:$12 sps:$4 sm:$0xff]  }
  0x2e   :  { %v833_v40 = vld [vmem:[%s1067_s0 + $0xb0] ss:$12 sps:$4 sm:$0xff]   ;;  %v828_v43 = vld [vmem:[%s1067_s0 + $0x78] ss:$12 sps:$4 sm:$0xff]   ;;  %v829_v44 = vld [vmem:[%s1067_s0 + $0x94] ss:$12 sps:$4 sm:$0xff]  }
  0x2f   :  { %v831_v45 = vld [vmem:[%s1067_s0 + $0x90] ss:$12 sps:$4 sm:$0xff]   ;;  %v834_v46 = vld [vmem:[%s1067_s0 + $0xac] ss:$12 sps:$4 sm:$0xff]   ;;  %v836_v47 = vld [vmem:[%s1067_s0 + $0xa8] ss:$12 sps:$4 sm:$0xff]  }
  0x30   :  { %v1031_v50 = vld [vmem:[%s1069_s2] ss:$0 sm:$0xff]  ;;  %s861_s0 = smov [#allocation2]  }
  0x31   :  { %s606_s2 = sshll.u32 %s861_s0, 4  ;;  %s607_s2 = int_to_ptr.vmem [resolvable:$true] %s606_s2 }
  0x32   :  { %424 = vmatmul.mubr.bf16.gmra.mrb[8].mxu0 %v815_v34  ;;  %s837_s27 = scalar_lea.vmem %s607_s2, 2048  ;;  %p842_p1 = scmp.lt.s32.totalorder %s607_s2, %s607_s2 }
  0x33   :  { %431 = vmatprep.mubr.bf16.mxu0 %v818_v35  ;;  %p838_p0 = scmp.ne.s32.totalorder %s607_s2, %s837_s27  ;;  %p843_p2 = scmp.lt.s32.totalorder %s837_s27, %s837_s27 }
  0x34   :  { %771 = vmatmul.mubr.bf16.gmra.mrb[8].mxu1 %v825_v36 }
  0x35   :  { %774 = vmatprep.mubr.bf16.mxu1 %v832_v37  ;;  %p844_p3 = por %p843_p2, %p842_p1 }
  0x37   :  { %p845_p4 = pnand %p844_p3, %p838_p0 }
  0x3a   :  { %432 = vmatmul.mubr.bf16.gmra.mrb[12].mxu0 %v820_v38 }
  0x3b   :  { %439 = vmatprep.mubr.bf16.mxu0 %v821_v39 }
  0x3c   :  { %775 = vmatmul.mubr.bf16.gmra.mrb[12].mxu1 %v833_v40 }
  0x42   :  { %440 = vmatmul.mubr.bf16.gmra.mrb[16].mxu0 %v823_v41 }
  0x43   :  { %447 = vmatprep.mubr.bf16.mxu0 %v826_v42 }
  0x4a   :  { %448 = vmatmul.mubr.bf16.gmra.mrb[20].mxu0 %v828_v43 }
  0x4b   :  { %455 = vmatprep.mubr.bf16.mxu0 %v829_v44 }
  0x52   :  { %456 = vmatmul.mubr.bf16.gmra.mrb[24].mxu0 %v831_v45 }
  0x53   :  { %463 = vmatprep.mubr.bf16.mxu0 %v834_v46 }
  0x5a   :  { %464 = vmatmul.mubr.bf16.gmra.mrb[28].mxu0 %v836_v47 }
  0xf5   :  { %v682_v48 = vpop.f32.mrb[0].mxu0 }
  0xf6   :  { %v683_v49 = vpop.f32.mrb[1].mxu0 }
  0xf7   :  { %v684_v51 = vadd.f32 %v683_v49, %v682_v48  ;;  %v685_v52 = vpop.f32.mrb[2].mxu0  ;;  %v764_v54 = vpop.f32.mrb[0].mxu1 }
  0xf8   :  { %v686_v53 = vpop.f32.mrb[3].mxu0  ;;  %v506_v57 = vpop.f32.mrb[1].mxu1 }
  0xf9   :  { %v687_v55 = vadd.f32 %v686_v53, %v685_v52  ;;  %v410_v56 = vadd.f32 %v684_v51, %v1031_v50  ;;  %v765_v58 = vpop.f32.mrb[2].mxu1 }
  0xfa   :  { %v509_v61 = vpop.f32.mrb[3].mxu1 }
  0xfb   :  { %v507_v59 = vadd.f32 %v506_v57, %v410_v56  ;;  %v413_v60 = vadd.f32 %v687_v55, %v1031_v50 }
  0xfd   :  { %v569_v62 = vmax.f32 %v507_v59, 0.0  ;;  %v510_v63 = vadd.f32 %v509_v61, %v413_v60  ;;  %v688_v0 = vpop.f32.mrb[4].mxu0 }
  0xfe   :  { %v689_v1 = vpop.f32.mrb[5].mxu0 }
  0xff   :  { %585 = vst [vmem:[#allocation2] sm:$0xff] %v569_v62  ;;  %v570_v2 = vmax.f32 %v510_v63, 0.0  ;;  %v690_v3 = vadd.f32 %v689_v1, %v688_v0  ;;  %v691_v4 = vpop.f32.mrb[6].mxu0  ;;  %v768_v6 = vpop.f32.mrb[4].mxu1 }
 0x100   :  { %v692_v5 = vpop.f32.mrb[7].mxu0  ;;  %v522_v9 = vpop.f32.mrb[5].mxu1 }
 0x101   :  { %586 = vst [vmem:[#allocation2 + $0x8] sm:$0xff] %v570_v2  ;;  %v418_v7 = vadd.f32 %v690_v3, %v1031_v50  ;;  %v693_v8 = vadd.f32 %v692_v5, %v691_v4  ;;  %v769_v10 = vpop.f32.mrb[6].mxu1 }
 0x102   :  { %v525_v13 = vpop.f32.mrb[7].mxu1 }
 0x103   :  { %v515_v11 = vadd.f32 %v764_v54, %v418_v7  ;;  %v421_v12 = vadd.f32 %v693_v8, %v1031_v50 }
 0x105   :  { %v571_v14 = vmax.f32 %v515_v11, 0.0  ;;  %v518_v15 = vadd.f32 %v765_v58, %v421_v12  ;;  %v694_v16 = vpop.f32.mrb[8].mxu0 }
 0x106   :  { %v695_v17 = vpop.f32.mrb[9].mxu0 }
 0x107   :  { %587 = vst [vmem:[#allocation2 + $0x10] sm:$0xff] %v571_v14  ;;  %v572_v18 = vmax.f32 %v518_v15, 0.0  ;;  %v696_v19 = vadd.f32 %v695_v17, %v694_v16  ;;  %v697_v20 = vpop.f32.mrb[10].mxu0  ;;  %v772_v22 = vpop.f32.mrb[8].mxu1 }
 0x108   :  { %v698_v21 = vpop.f32.mrb[11].mxu0  ;;  %v538_v25 = vpop.f32.mrb[9].mxu1 }
 0x109   :  { %588 = vst [vmem:[#allocation2 + $0x18] sm:$0xff] %v572_v18  ;;  %v699_v23 = vadd.f32 %v698_v21, %v697_v20  ;;  %v426_v24 = vadd.f32 %v696_v19, %v1031_v50  ;;  %v773_v26 = vpop.f32.mrb[10].mxu1 }
 0x10a   :  { %v541_v29 = vpop.f32.mrb[11].mxu1 }
 0x10b   :  { %v523_v27 = vadd.f32 %v522_v9, %v426_v24  ;;  %v429_v28 = vadd.f32 %v699_v23, %v1031_v50 }
 0x10d   :  { %v573_v30 = vmax.f32 %v523_v27, 0.0  ;;  %v526_v31 = vadd.f32 %v525_v13, %v429_v28  ;;  %v700_v32 = vpop.f32.mrb[12].mxu0 }
 0x10e   :  { %v701_v33 = vpop.f32.mrb[13].mxu0 }
 0x10f   :  { %589 = vst [vmem:[#allocation2 + $0x20] sm:$0xff] %v573_v30  ;;  %v574_v34 = vmax.f32 %v526_v31, 0.0  ;;  %v702_v35 = vadd.f32 %v701_v33, %v700_v32  ;;  %v703_v36 = vpop.f32.mrb[14].mxu0  ;;  %v1039_v38 = vpop.f32.mrb[12].mxu1 }
 0x110   :  { %v704_v37 = vpop.f32.mrb[15].mxu0  ;;  %v554_v41 = vpop.f32.mrb[13].mxu1 }
 0x111   :  { %590 = vst [vmem:[#allocation2 + $0x28] sm:$0xff] %v574_v34  ;;  %v434_v39 = vadd.f32 %v702_v35, %v1031_v50  ;;  %v705_v40 = vadd.f32 %v704_v37, %v703_v36  ;;  %v1042_v42 = vpop.f32.mrb[14].mxu1 }
 0x112   :  { %v557_v45 = vpop.f32.mrb[15].mxu1 }
 0x113   :  { %v531_v43 = vadd.f32 %v768_v6, %v434_v39  ;;  %v437_v44 = vadd.f32 %v705_v40, %v1031_v50 }
 0x115   :  { %v575_v46 = vmax.f32 %v531_v43, 0.0  ;;  %v534_v47 = vadd.f32 %v769_v10, %v437_v44  ;;  %v706_v48 = vpop.f32.mrb[16].mxu0 }
 0x116   :  { %v707_v49 = vpop.f32.mrb[17].mxu0 }
 0x117   :  { %591 = vst [vmem:[#allocation2 + $0x30] sm:$0xff] %v575_v46  ;;  %v576_v51 = vmax.f32 %v534_v47, 0.0  ;;  %v708_v52 = vadd.f32 %v707_v49, %v706_v48  ;;  %v709_v53 = vpop.f32.mrb[18].mxu0 }
 0x118   :  { %v710_v54 = vpop.f32.mrb[19].mxu0 }
 0x119   :  { %592 = vst [vmem:[#allocation2 + $0x38] sm:$0xff] %v576_v51  ;;  %v711_v55 = vadd.f32 %v710_v54, %v709_v53  ;;  %v442_v56 = vadd.f32 %v708_v52, %v1031_v50 }
 0x11b   :  { %v539_v57 = vadd.f32 %v538_v25, %v442_v56  ;;  %v445_v58 = vadd.f32 %v711_v55, %v1031_v50 }
 0x11d   :  { %v577_v59 = vmax.f32 %v539_v57, 0.0  ;;  %v542_v60 = vadd.f32 %v541_v29, %v445_v58  ;;  %v712_v61 = vpop.f32.mrb[20].mxu0 }
 0x11e   :  { %v713_v62 = vpop.f32.mrb[21].mxu0 }
 0x11f   :  { %593 = vst [vmem:[#allocation2 + $0x40] sm:$0xff] %v577_v59  ;;  %v578_v63 = vmax.f32 %v542_v60, 0.0  ;;  %v714_v0 = vadd.f32 %v713_v62, %v712_v61  ;;  %v715_v1 = vpop.f32.mrb[22].mxu0 }
 0x120   :  { %v716_v2 = vpop.f32.mrb[23].mxu0 }
 0x121   :  { %594 = vst [vmem:[#allocation2 + $0x48] sm:$0xff] %v578_v63  ;;  %v450_v3 = vadd.f32 %v714_v0, %v1031_v50  ;;  %v717_v4 = vadd.f32 %v716_v2, %v715_v1 }
 0x123   :  { %v547_v5 = vadd.f32 %v772_v22, %v450_v3  ;;  %v453_v6 = vadd.f32 %v717_v4, %v1031_v50 }
 0x125   :  { %v579_v7 = vmax.f32 %v547_v5, 0.0  ;;  %v550_v8 = vadd.f32 %v773_v26, %v453_v6  ;;  %v718_v9 = vpop.f32.mrb[24].mxu0 }
 0x126   :  { %v719_v10 = vpop.f32.mrb[25].mxu0 }
 0x127   :  { %595 = vst [vmem:[#allocation2 + $0x50] sm:$0xff] %v579_v7  ;;  %v580_v11 = vmax.f32 %v550_v8, 0.0  ;;  %v720_v12 = vadd.f32 %v719_v10, %v718_v9  ;;  %v721_v13 = vpop.f32.mrb[26].mxu0 }
 0x128   :  { %v722_v14 = vpop.f32.mrb[27].mxu0 }
 0x129   :  { %596 = vst [vmem:[#allocation2 + $0x58] sm:$0xff] %v580_v11  ;;  %v723_v15 = vadd.f32 %v722_v14, %v721_v13  ;;  %v458_v16 = vadd.f32 %v720_v12, %v1031_v50 }
 0x12b   :  { %v555_v17 = vadd.f32 %v554_v41, %v458_v16  ;;  %v461_v18 = vadd.f32 %v723_v15, %v1031_v50 }
 0x12d   :  { %v581_v19 = vmax.f32 %v555_v17, 0.0  ;;  %v558_v20 = vadd.f32 %v557_v45, %v461_v18  ;;  %v724_v21 = vpop.f32.mrb[28].mxu0 }
 0x12e   :  { %v725_v22 = vpop.f32.mrb[29].mxu0 }
 0x12f   :  { %597 = vst [vmem:[#allocation2 + $0x60] sm:$0xff] %v581_v19  ;;  %v582_v23 = vmax.f32 %v558_v20, 0.0  ;;  %v726_v24 = vadd.f32 %v725_v22, %v724_v21  ;;  %v727_v25 = vpop.f32.mrb[30].mxu0 }
 0x130   :  { %v728_v26 = vpop.f32.mrb[31].mxu0 }
 0x131   :  { %598 = vst [vmem:[#allocation2 + $0x68] sm:$0xff] %v582_v23  ;;  %v466_v27 = vadd.f32 %v726_v24, %v1031_v50  ;;  %v729_v28 = vadd.f32 %v728_v26, %v727_v25 }
 0x133   :  { %v563_v29 = vadd.f32 %v1039_v38, %v466_v27  ;;  %v469_v30 = vadd.f32 %v729_v28, %v1031_v50 }
 0x135   :  { %v583_v31 = vmax.f32 %v563_v29, 0.0  ;;  %v566_v32 = vadd.f32 %v1042_v42, %v469_v30 }
 0x137   :  { %599 = vst [vmem:[#allocation2 + $0x70] sm:$0xff] %v583_v31  ;;  %v584_v33 = vmax.f32 %v566_v32, 0.0 }
 0x139   :  { %600 = vst [vmem:[#allocation2 + $0x78] sm:$0xff] %v584_v33 }
 0x13a   :  { %848 = shalt.err (!%p845_p4)
}
 0x13b   :  { %s849_s30 = scalar_lea.hbm %s1070_s3, 2048 }
 0x13c   :  { %p850_p5 = scmp.ne.s32.totalorder %s1070_s3, %s849_s30  ;;  %p853_p6 = scmp.lt.u32.totalorder %s849_s30, %s1070_s3 }
 0x13e   :  { %p855_p7 = pnand %p853_p6, %p850_p5 }
 0x140   :  { %858 = shalt.err (!%p855_p7)
}
 0x141   :  { %s862_s8 = smov 128   ;;  %s863_s9 = smov 8  }
 0x142   :  { %612 = dma.vmem_to_hbm [thread:$0]  %s607_s2, 2048, %s1070_s3, [#allocation3], %s862_s8, %s862_s8, %s863_s9  }
 0x143   :  { %859 = dma.done.wait [#allocation3], 2048  }
 0x144   :  { %860 = vsyncadd [#allocation3], 4294965248 }
 0x145   :  { %616 = vsyncpa [#allocation3], 1 }

</bundles_post_ra>
